<compile_context>
chip_gen: v6e
topology: v6e:2x2x1
jax: 0.10.0
libtpu: 0.0.40
codegen_flags: <defaults>
</compile_context>

<pallas_src>
import jax
import jax.numpy as jnp
from jax import lax
from jax.experimental import pallas as pl
from jax.experimental.pallas import tpu as pltpu

_SQRT_HALF = 0.7071067811865476


def _round_up(x, m):
    return -(-x // m) * m


def _vmem_capacity_bytes():
    try:
        return int(pltpu.get_tpu_info().vmem_capacity_bytes)
    except Exception:
        return 64 * 1024 * 1024  # conservative default (v7x-sized VMEM)


def _gelu_erf_f32(h):
    # Exact (erf) GELU in f32 — matches torch.nn.GELU default.
    return 0.5 * h * (1.0 + lax.erf(h * jnp.float32(_SQRT_HALF)))


def _ffn_kernel_resident(x_ref, w1_ref, b1_ref, w2_ref, b2_ref, o_ref):
    # x_ref : (C, t_hw)   channel-major activation tile (lanes = spatial)
    # w1_ref: (hidden, C) full conv1 weight (VMEM-resident, grid-invariant)
    # b1_ref: (hidden, 1) f32 conv1 bias
    # w2_ref: (C, hidden) full conv2 weight
    # b2_ref: (C, 1)      f32 conv2 bias
    # o_ref : (C, t_hw)
    h = jnp.dot(w1_ref[...], x_ref[...], preferred_element_type=jnp.float32)
    h = _gelu_erf_f32(h + b1_ref[...])
    o = jnp.dot(w2_ref[...], h.astype(w2_ref.dtype),
                preferred_element_type=jnp.float32)
    o_ref[...] = (o + b2_ref[...]).astype(o_ref.dtype)


def _ffn_kernel_ktiled(x_ref, w1_ref, b1_ref, w2_ref, b2_ref, o_ref, acc_ref):
    # Hidden dimension tiled over the trailing "arbitrary" grid axis; f32 accumulator.
    k = pl.program_id(2)

    @pl.when(k == 0)
    def _():
        acc_ref[...] = jnp.zeros_like(acc_ref)

    h = jnp.dot(w1_ref[...], x_ref[...], preferred_element_type=jnp.float32)
    h = _gelu_erf_f32(h + b1_ref[...])
    acc_ref[...] += jnp.dot(w2_ref[...], h.astype(w2_ref.dtype),
                            preferred_element_type=jnp.float32)

    @pl.when(k == pl.num_programs(2) - 1)
    def _():
        o_ref[...] = (acc_ref[...] + b2_ref[...]).astype(o_ref.dtype)


def feedforward_pallas(x_nchw, w1, b1, w2, b2, *, tile_hw=1024, tile_k=512,
                       compute_dtype=jnp.bfloat16, resident_weights="auto"):
    """x_nchw: (N, dim, H, W). w1: (hidden, dim), b1: (hidden,), w2: (dim, hidden), b2: (dim,).

    compute_dtype: matmul operand dtype (default bf16 = fast MXU path; None keeps
    native).  Accumulation is always f32; output keeps the input dtype.
    resident_weights: "auto" (byte-budget decision), True or False (testing).
    """
    N, C, H, W = x_nchw.shape
    hidden = w1.shape[0]
    assert w1.shape == (hidden, C) and w2.shape == (C, hidden)
    assert b1.shape == (hidden,) and b2.shape == (C,)
    out_dtype = x_nchw.dtype

    if compute_dtype is not None:
        x_nchw = x_nchw.astype(compute_dtype)
        w1 = w1.astype(compute_dtype)
        w2 = w2.astype(compute_dtype)
    cdtype = x_nchw.dtype
    dsize = jnp.dtype(cdtype).itemsize
    osize = jnp.dtype(out_dtype).itemsize

    HW = H * W
    x = x_nchw.reshape(N, C, HW)                 # pure reshape: no HBM transpose/pad pass
    b1_r = b1.reshape(hidden, 1).astype(jnp.float32)   # biases added in f32
    b2_r = b2.reshape(C, 1).astype(jnp.float32)

    # ---- Generation-aware VMEM budgets. ----
    vmem_cap = _vmem_capacity_bytes()
    weight_budget = (24 << 20) if vmem_cap <= (64 << 20) else (56 << 20)
    total_budget = int(vmem_cap) * 7 // 10

    # ---- Spatial (lane) tile: multiple of 128, budget-bounded, >= 2 parallel tiles
    #      so both v7x TensorCores get work. ----
    t_hw = max(128, (min(int(tile_hw), _round_up(HW, 128)) // 128) * 128)

    def act_bytes(th, resident):
        b = 2 * C * th * dsize + 2 * C * th * osize       # double-buffered x + out tiles
        if not resident:
            b += C * th * 4                               # f32 accumulator scratch
        return b

    while act_bytes(t_hw, True) > total_budget // 2 and t_hw > 128:
        t_hw -= 128
    while N * pl.cdiv(HW, t_hw) < 2 and t_hw > 128:       # v7x megacore occupancy
        t_hw -= 128

    # ---- Keep W1/W2 fully VMEM-resident whenever they fit the budget. ----
    full_w_bytes = 2 * hidden * C * dsize + (hidden + C) * 4
    if resident_weights == "auto":
        resident = (full_w_bytes <= weight_budget and
                    full_w_bytes + act_bytes(t_hw, True) <= total_budget)
    else:
        resident = bool(resident_weights)

    n_hw = pl.cdiv(HW, t_hw)
    out_shape = jax.ShapeDtypeStruct((N, C, HW), out_dtype)
    x_blk = (None, C, t_hw)

    if resident:
        # Grid-invariant weight blocks: DMA'd once.  Single-buffer them when they are
        # large (halves weight VMEM); tiny weights keep the default (negligible).
        single_buf = full_w_bytes > (2 << 20) and hasattr(pl, "Buffered")

        def w_spec(shape):
            if single_buf:
                return pl.BlockSpec(shape, lambda n, j: (0, 0),
                                    pipeline_mode=pl.Buffered(1))
            return pl.BlockSpec(shape, lambda n, j: (0, 0))

        need = full_w_bytes * (1 if single_buf else 2) + act_bytes(t_hw, True)
        vmem_limit = int(min(vmem_cap * 9 // 10,
                             max(need * 13 // 10 + (2 << 20), 16 << 20)))

        out = pl.pallas_call(
            _ffn_kernel_resident,
            out_shape=out_shape,
            grid_spec=pltpu.PrefetchScalarGridSpec(
                num_scalar_prefetch=0,
                grid=(N, n_hw),
                in_specs=[
                    pl.BlockSpec(x_blk, lambda n, j: (n, 0, j)),
                    w_spec((hidden, C)),
                    w_spec((hidden, 1)),
                    w_spec((C, hidden)),
                    w_spec((C, 1)),
                ],
                out_specs=pl.BlockSpec(x_blk, lambda n, j: (n, 0, j)),
            ),
            compiler_params=pltpu.CompilerParams(
                dimension_semantics=("parallel", "parallel"),
                vmem_limit_bytes=vmem_limit),
        )(x, w1, b1_r, w2, b2_r)
    else:
        # Hidden chunking: MXU-aligned t_k (256 preferred, 128 floor); zero-pad hidden
        # so partial chunks never read garbage (zero rows/cols contribute exactly 0).
        align = 256 if min(int(tile_k), hidden) >= 256 else 128
        t_k = max(align, (min(int(tile_k), _round_up(hidden, align)) // align) * align)
        while t_k > align and (2 * (2 * t_k * C * dsize + (t_k + C) * 4)
                               + act_bytes(t_hw, False) > total_budget):
            t_k -= align
        hidden_p = _round_up(hidden, t_k)
        if hidden_p != hidden:
            pad = hidden_p - hidden
            w1 = jnp.pad(w1, ((0, pad), (0, 0)))
            b1_r = jnp.pad(b1_r, ((0, pad), (0, 0)))
            w2 = jnp.pad(w2, ((0, 0), (0, pad)))

        need = (2 * (2 * t_k * C * dsize + (t_k + C) * 4) + act_bytes(t_hw, False))
        vmem_limit = int(min(vmem_cap * 9 // 10,
                             max(need * 13 // 10 + (2 << 20), 16 << 20)))

        out = pl.pallas_call(
            _ffn_kernel_ktiled,
            out_shape=out_shape,
            grid_spec=pltpu.PrefetchScalarGridSpec(
                num_scalar_prefetch=0,
                grid=(N, n_hw, hidden_p // t_k),
                in_specs=[
                    pl.BlockSpec(x_blk, lambda n, j, k: (n, 0, j)),
                    pl.BlockSpec((t_k, C), lambda n, j, k: (k, 0)),
                    pl.BlockSpec((t_k, 1), lambda n, j, k: (k, 0)),
                    pl.BlockSpec((C, t_k), lambda n, j, k: (0, k)),
                    pl.BlockSpec((C, 1), lambda n, j, k: (0, 0)),
                ],
                out_specs=pl.BlockSpec(x_blk, lambda n, j, k: (n, 0, j)),
                scratch_shapes=[pltpu.VMEM((C, t_hw), jnp.float32)],
            ),
            compiler_params=pltpu.CompilerParams(
                dimension_semantics=("parallel", "parallel", "arbitrary"),
                vmem_limit_bytes=vmem_limit),
        )(x, w1, b1_r, w2, b2_r)

    return out.reshape(N, C, H, W)


def feedforward_ref(x_nchw, w1, b1, w2, b2):
    """Pure-JAX reference mirroring the PyTorch forward (eval mode)."""
    N, C, H, W = x_nchw.shape
    x_tok = jnp.transpose(x_nchw, (0, 2, 3, 1)).reshape(-1, C).astype(jnp.float32)
    h = x_tok @ w1.T.astype(jnp.float32) + b1.astype(jnp.float32)
    h = 0.5 * h * (1.0 + lax.erf(h / jnp.sqrt(jnp.float32(2.0))))
    o = h @ w2.T.astype(jnp.float32) + b2.astype(jnp.float32)
    return jnp.transpose(o.reshape(N, H, W, C), (0, 3, 1, 2)).astype(x_nchw.dtype)


if __name__ == "__main__":
    # Small shapes consistent with FeedForward(dim=4, hidden_dim=32) on a 2x4x16x16 input.
    N, dim, Hs, Ws = 2, 4, 16, 16
    hidden_dim = 32

    key = jax.random.PRNGKey(0)
    kx, kw1, kb1, kw2, kb2 = jax.random.split(key, 5)

    x = jax.random.normal(kx, (N, dim, Hs, Ws), dtype=jnp.float32)
    # Conv2d(dim, hidden_dim, 1x1): weight (hidden_dim, dim, 1, 1) -> stored as (hidden_dim, dim).
    w1 = jax.random.normal(kw1, (hidden_dim, dim), dtype=jnp.float32) * 0.1
    b1 = jax.random.normal(kb1, (hidden_dim,), dtype=jnp.float32) * 0.1
    # Conv2d(hidden_dim, dim, 1x1): weight (dim, hidden_dim).
    w2 = jax.random.normal(kw2, (dim, hidden_dim), dtype=jnp.float32) * 0.1
    b2 = jax.random.normal(kb2, (dim,), dtype=jnp.float32) * 0.1

    ref = feedforward_ref(x, w1, b1, w2, b2)

    # f32 path, resident weights: must match the reference tightly.
    out_f32 = jax.block_until_ready(
        feedforward_pallas(x, w1, b1, w2, b2, compute_dtype=None))
    assert out_f32.shape == (N, dim, Hs, Ws)
    assert jnp.allclose(out_f32, ref, atol=1e-5, rtol=1e-5), "f32 resident mismatch"

    # f32 path, forced hidden-tiling fallback (exercises k-axis + hidden zero-padding).
    out_kt = jax.block_until_ready(
        feedforward_pallas(x, w1, b1, w2, b2, compute_dtype=None,
                           resident_weights=False))
    assert jnp.allclose(out_kt, ref, atol=1e-5, rtol=1e-5), "f32 k-tiled mismatch"

    # Default bf16 fast-MXU path: f32 accumulation, bf16-appropriate tolerance.
    out_bf16 = jax.block_until_ready(feedforward_pallas(x, w1, b1, w2, b2))
    assert jnp.allclose(out_bf16, ref, atol=5e-2, rtol=5e-2), "bf16 mismatch vs reference"

    print("KERNEL_OK")
</pallas_src>

<mosaic_0001>
module attributes {stable_mosaic.version = 11 : i64} {
  func.func @_ffn_kernel_resident(%arg0: i32, %arg1: i32, %arg2: memref<1x4x256xf32, #tpu.memory_space<vmem>>, %arg3: memref<32x4xf32, #tpu.memory_space<vmem>>, %arg4: memref<32x1xf32, #tpu.memory_space<vmem>>, %arg5: memref<4x32xf32, #tpu.memory_space<vmem>>, %arg6: memref<4x1xf32, #tpu.memory_space<vmem>>, %arg7: memref<1x4x256xf32, #tpu.memory_space<vmem>>) attributes {dimension_semantics = [#tpu.dimension_semantics<parallel>, #tpu.dimension_semantics<parallel>], iteration_bounds = array<i64: 2, 1>, scalar_prefetch = 0 : i64, scratch_operands = 0 : i64, tpu.core_type = #tpu.core_type<tc>, window_params = [{transform_indices = @transform_0, window_bounds = array<i64: 1, 4, 256>}, {pipeline_mode = #tpu.pipeline_mode<synchronous>, transform_indices = @transform_1, window_bounds = array<i64: 32, 4>}, {pipeline_mode = #tpu.pipeline_mode<synchronous>, transform_indices = @transform_2, window_bounds = array<i64: 32, 1>}, {pipeline_mode = #tpu.pipeline_mode<synchronous>, transform_indices = @transform_3, window_bounds = array<i64: 4, 32>}, {pipeline_mode = #tpu.pipeline_mode<synchronous>, transform_indices = @transform_4, window_bounds = array<i64: 4, 1>}, {transform_indices = @transform_5, window_bounds = array<i64: 1, 4, 256>}]} {
    %c0 = arith.constant 0 : index
    %c0_0 = arith.constant 0 : index
    %0 = vector.load %arg3[%c0, %c0_0] : memref<32x4xf32, #tpu.memory_space<vmem>>, vector<32x4xf32>
    %c0_1 = arith.constant 0 : index
    %c0_2 = arith.constant 0 : index
    %c0_3 = arith.constant 0 : index
    %1 = vector.load %arg2[%c0_1, %c0_2, %c0_3] : memref<1x4x256xf32, #tpu.memory_space<vmem>>, vector<1x4x256xf32>
    %2 = vector.shape_cast %1 : vector<1x4x256xf32> to vector<4x256xf32>
    %cst = arith.constant dense<0.000000e+00> : vector<32x256xf32>
    %3 = tpu.matmul %0, %2, %cst {dimension_numbers = #tpu.dot_dimension_numbers<[1], [0], [0], [1], [0, 0, 1, 1], [], []>} : vector<32x4xf32>, vector<4x256xf32>, vector<32x256xf32> -> vector<32x256xf32>
    %c0_4 = arith.constant 0 : index
    %c0_5 = arith.constant 0 : index
    %4 = vector.load %arg4[%c0_4, %c0_5] : memref<32x1xf32, #tpu.memory_space<vmem>>, vector<32x1xf32>
    %5 = vector.broadcast %4 : vector<32x1xf32> to vector<32x256xf32>
    %6 = arith.addf %3, %5 : vector<32x256xf32>
    %cst_6 = arith.constant 5.000000e-01 : f32
    %7 = vector.broadcast %cst_6 : f32 to vector<32x256xf32>
    %8 = arith.mulf %7, %6 : vector<32x256xf32>
    %cst_7 = arith.constant 0.707106769 : f32
    %9 = vector.broadcast %cst_7 : f32 to vector<32x256xf32>
    %10 = arith.mulf %6, %9 : vector<32x256xf32>
    %11 = math.erf %10 : vector<32x256xf32>
    %cst_8 = arith.constant 1.000000e+00 : f32
    %12 = vector.broadcast %cst_8 : f32 to vector<32x256xf32>
    %13 = arith.addf %12, %11 : vector<32x256xf32>
    %14 = arith.mulf %8, %13 : vector<32x256xf32>
    %c0_9 = arith.constant 0 : index
    %c0_10 = arith.constant 0 : index
    %15 = vector.load %arg5[%c0_9, %c0_10] : memref<4x32xf32, #tpu.memory_space<vmem>>, vector<4x32xf32>
    %cst_11 = arith.constant dense<0.000000e+00> : vector<4x256xf32>
    %16 = tpu.matmul %15, %14, %cst_11 {dimension_numbers = #tpu.dot_dimension_numbers<[1], [0], [0], [1], [0, 0, 1, 1], [], []>} : vector<4x32xf32>, vector<32x256xf32>, vector<4x256xf32> -> vector<4x256xf32>
    %c0_12 = arith.constant 0 : index
    %c0_13 = arith.constant 0 : index
    %17 = vector.load %arg6[%c0_12, %c0_13] : memref<4x1xf32, #tpu.memory_space<vmem>>, vector<4x1xf32>
    %18 = vector.broadcast %17 : vector<4x1xf32> to vector<4x256xf32>
    %19 = arith.addf %16, %18 : vector<4x256xf32>
    %c0_14 = arith.constant 0 : index
    %c0_15 = arith.constant 0 : index
    %c0_16 = arith.constant 0 : index
    %20 = vector.load %arg7[%c0_14, %c0_15, %c0_16] : memref<1x4x256xf32, #tpu.memory_space<vmem>>, vector<1x4x256xf32>
    %21 = vector.shape_cast %20 : vector<1x4x256xf32> to vector<4x256xf32>
    %22 = vector.shape_cast %19 : vector<4x256xf32> to vector<1x4x256xf32>
    tpu.vector_store %arg7[%c0_14, %c0_15, %c0_16], %22 {strides = array<i32>} : memref<1x4x256xf32, #tpu.memory_space<vmem>>, vector<1x4x256xf32>,
    return
  }
  func.func @transform_0(%arg0: i32, %arg1: i32) -> (i32, i32, i32) {
    %c0_i32 = arith.constant 0 : i32
    %c0_i32_0 = arith.constant 0 : i32
    return %arg0, %c0_i32, %arg1 : i32, i32, i32
  }
  func.func @transform_1(%arg0: i32, %arg1: i32) -> (i32, i32) {
    %c0_i32 = arith.constant 0 : i32
    %c0_i32_0 = arith.constant 0 : i32
    %c0_i32_1 = arith.constant 0 : i32
    return %c0_i32, %c0_i32_0 : i32, i32
  }
  func.func @transform_2(%arg0: i32, %arg1: i32) -> (i32, i32) {
    %c0_i32 = arith.constant 0 : i32
    %c0_i32_0 = arith.constant 0 : i32
    %c0_i32_1 = arith.constant 0 : i32
    return %c0_i32, %c0_i32_0 : i32, i32
  }
  func.func @transform_3(%arg0: i32, %arg1: i32) -> (i32, i32) {
    %c0_i32 = arith.constant 0 : i32
    %c0_i32_0 = arith.constant 0 : i32
    %c0_i32_1 = arith.constant 0 : i32
    return %c0_i32, %c0_i32_0 : i32, i32
  }
  func.func @transform_4(%arg0: i32, %arg1: i32) -> (i32, i32) {
    %c0_i32 = arith.constant 0 : i32
    %c0_i32_0 = arith.constant 0 : i32
    %c0_i32_1 = arith.constant 0 : i32
    return %c0_i32, %c0_i32_0 : i32, i32
  }
  func.func @transform_5(%arg0: i32, %arg1: i32) -> (i32, i32, i32) {
    %c0_i32 = arith.constant 0 : i32
    %c0_i32_0 = arith.constant 0 : i32
    return %arg0, %c0_i32, %arg1 : i32, i32, i32
  }
}

</mosaic_0001>

<bundles_post_ra>
// kernel: tpu_custom_call.1
= control target key start
LH: loop header
LB: loop body
LE: loop exit
PB: predicated region body
PF: predicated region fallthrough
CT: control target
= control target key end

     0   :  { %10 = vsyncpa [#allocation3], 0  ;;  %s950_s0 = inlined_call_operand.vmem [shape: f32[2,4,256], index: 0, kind: input, shape index: {}]   ;;  %s951_s1 = inlined_call_operand.vmem [shape: f32[32,4], index: 1, kind: input, shape index: {}]   ;;  %s952_s2 = inlined_call_operand.vmem [shape: f32[32,1], index: 2, kind: input, shape index: {}]   ;;  %s953_s3 = inlined_call_operand.vmem [shape: f32[4,32], index: 3, kind: input, shape index: {}]   ;;  %s954_s4 = inlined_call_operand.vmem [shape: f32[4,1], index: 4, kind: input, shape index: {}]   ;;  %s955_s5 = inlined_call_operand.hbm [shape: f32[2,4,256], index: 5, kind: output, shape index: {}]  }
   0x1   :  { %12 = vsyncpa [#allocation3 + $0x1], 0  ;;  %s821_s18 = smov 0   ;;  %s823_s19 = smov 0  }
   0x2   :  { %s825_s20 = smov 0   ;;  %s827_s21 = smov 0  }
   0x3   :  { %s829_s22 = smov 0   ;;  %s831_s23 = smov 0  }
   0x4 LB: > { %s612_s24 = sadd.s32 4294967295, %s786_s23   ;;  %s613_s25 = sadd.s32 4294967294, %s786_s23   ;;  %s786_s23 = sphi %s831_s23, %s18_s23   ;;  %s782_s22 = sphi %s829_s22, %s962_s22   ;;  %s778_s21 = sphi %s827_s21, %s961_s21   ;;  %s774_s20 = sphi %s825_s20, %s960_s20   ;;  %s770_s19 = sphi %s823_s19, %s959_s19   ;;  %s766_s18 = sphi %s821_s18, %s958_s18  }
   0x5   : > { %s30_s26 = sadd.s32 1, %s782_s22  ;;  %s151_s27 = sadd.s32 1, %s774_s20 }
   0x6   : > { %p32_p0 = scmp.ge.s32.totalorder %s30_s26, 2  ;;  %p161_p1 = scmp.ne.s32.totalorder %s774_s20, %s770_s19 }
   0x7   : > { %p162_p2 = scmp.eq.s32.totalorder %s612_s24, 1  ;;  %p167_p3 = scmp.ne.s32.totalorder %s770_s19, %s766_s18 }
   0x8   : > { %s964_s26 = smov (%p32_p0, %s30_s26), 0  ;;  %p168_p5 = scmp.eq.s32.totalorder %s613_s25, 1 }
   0x9   : > { %p861_p4 = por %p162_p2, %p161_p1  ;;  %s146_s29 = ssub.s32 %s782_s22, %s964_s26 }
   0xa   : > { %p616_p6 = scmp.ge.s32.totalorder %s786_s23, 1  ;;  %p149_p7 = scmp.eq.s32.totalorder %s146_s29, 0 }
   0xb   : > { %p868_p8 = por %p168_p5, %p167_p3  ;;  %p211_p9 = scmp.lt.s32.totalorder %s786_s23, 3 }
   0xc   : > { %s874_s6 = scalar_select %p149_p7, %s774_s20, %s151_s27  }
   0xd   : > { %p212_p10 = pnand %p616_p6, %p211_p9 }
   0xe   : > { %p244_p11 = scmp.lt.s32.totalorder (!%p212_p10), %s778_s21, 1  ;;  %s240_s17 = sand.u32 (!%p212_p10), 1, %s770_s19  }
   0xf   : > { %215 = sbr.rel (%p212_p10) target bundleno = 479 (0x1df), region = 40  ;;  %s617_s24 = sshll.u32 (!%p212_p10), %s240_s17, 3 }
  0x10   : > { %s242_s27 = scalar_lea.vmem (!%p212_p10), [#allocation2], %s617_s24  ;;  %s520_s10 = scalar_lea.sflag (!%p212_p10), [#allocation3], %s240_s17 }
  0x11   : > { %s536_s29 = sshll.u32 (!%p212_p10), %s242_s27, 4  ;;  %s537_s29 = int_to_ptr.vmem [resolvable:$true] %s536_s29 }
  0x12   : > { %s710_s11 = scalar_lea.vmem (!%p212_p10), %s537_s29, 128 }
  0x13   : > { %p711_p12 = scmp.ne.s32.totalorder (!%p212_p10), %s537_s29, %s710_s11 }
  0x14   : > { %v788_v0 = vmov 0.0   ;;  %v260_v1 = vld [vmem:[%s952_s2 + $0x8] sm:$0xff]  ;;  %s245_s9 = scalar_select %p244_p11, %s778_s21, 1  ;;  %v789_v2 = vmov 0   ;;  %v262_v3 = vld [vmem:[%s952_s2 + $0x18] sm:$0xff]  ;;  %v259_v4 = vld [vmem:[%s952_s2] sm:$0xff] }
  0x15   : > { %367 = vmatprep.mubr.f32.mxu0 %v788_v0  ;;  %507 = vmatprep.mubr.f32.mxu1 %v788_v0  ;;  %v261_v5 = vld [vmem:[%s952_s2 + $0x10] sm:$0xff]  ;;  %vm298_vm0 = vcmask 1043456   ;;  %v254_v8 = vld [vmem:[%s951_s1] sm:$0xff]  ;;  %vm285_vm1 = vcmask 31744   ;;  %v255_v10 = vld [vmem:[%s951_s1 + $0x8] sm:$0xff]  ;;  %vm439_vm2 = vcmask 261120   ;;  %p712_p13 = pnand %p711_p12, %p861_p4 }
  0x16   : > { %692 = vset.pattern.permute.xlu1 %v789_v2  ;;  %691 = vset.pattern.permute.xlu0 %v789_v2  ;;  %s632_s12 = sshll.u32 %s245_s9, 3  ;;  %v433_v9 = vld [vmem:[%s954_s4] sm:$0xf]  ;;  %v256_v11 = vld [vmem:[%s951_s1 + $0x10] sm:$0xff]  ;;  %v257_v12 = vld [vmem:[%s951_s1 + $0x18] sm:$0xff] }
  0x17   : > { %270 = vperm.xlu1 %692, %v260_v1   ;;  %280 = vperm.xlu0 %691, %v262_v3   ;;  %s251_s25 = scalar_lea.vmem %s950_s0, %s632_s12  ;;  %p713_p0 = pneg %p712_p13 }
  0x18   : > { %v258_v6 = vld [vmem:[%s251_s25] sm:$0xff]  ;;  %s633_s25 = sshll.u32 %s778_s21, 7  ;;  %s790_s12 = smov [#allocation2]  }
  0x19   : > { %v284_v7 = vcombine.high %v258_v6, %v258_v6  ;;  %s534_s9 = scalar_lea.hbm %s955_s5, %s633_s25  ;;  %s714_s13 = sshll.u32 %s790_s12, 4  ;;  %s715_s13 = int_to_ptr.vmem [resolvable:$false] %s714_s13 }
  0x1a   : > { %s716_s21 = scalar_lea.vmem %s715_s13, 256  ;;  %p717_p1 = scmp.lt.s32.totalorder %s537_s29, %s715_s13 }
  0x1b   : > { %265 = vperm.xlu1 %692, %v259_v4   ;;  %275 = vperm.xlu0 %691, %v261_v5   ;;  %p718_p2 = scmp.lt.s32.totalorder %s716_s21, %s710_s11 }
  0x1c   : > { %620 = vmatprep.subr.msk.mxu0 %vm298_vm0, %v284_v7 }
  0x1d   : > { %621 = vmatpush1.msk.msra.mxu0 %vm298_vm0, %v258_v6  ;;  %p719_p3 = por %p718_p2, %p717_p1 }
  0x1e   : > { %622 = vmatmul.mubr.msk.f32.vlgmr.msra.gmra.mxu0 %vm285_vm1, %v254_v8 }
  0x1f   : > { %436 = vperm.xlu0 %691, %v433_v9   ;;  %373 = vmatprep.mubr.f32.mxu0 %v788_v0  ;;  %v432_v9 = vld [vmem:[%s953_s3] sm:$0xf]  ;;  %p720_p5 = pnand %p719_p3, %p713_p0 }
  0x22   : > { %623 = vmatmul.mubr.msk.f32.gmra.mxu0 %vm285_vm1, %v255_v10 }
  0x23   : > { %379 = vmatprep.mubr.f32.mxu0 %v788_v0 }
  0x26   : > { %624 = vmatmul.mubr.msk.f32.gmra.mxu0 %vm285_vm1, %v256_v11 }
  0x27   : > { %385 = vmatprep.mubr.f32.mxu0 %v788_v0 }
  0x2a   : > { %625 = vmatmul.mubr.msk.f32.gmra.mxu0 %vm285_vm1, %v257_v12 }
  0x92   : > { %v281_v14 = vpop.permute.xlu0 %280  ;;  %v271_v17 = vpop.permute.xlu1 %270 }
  0x96   : > { %v276_v20 = vpop.permute.xlu0 %275  ;;  %v266_v24 = vpop.permute.xlu1 %265 }
  0x9a   : > { %v437_v11 = vpop.permute.xlu0 %436 }
  0xde   : > { %v369_v13 = vpop.f32.mrf.mxu0 }
  0xdf   : > { %v370_v32 = vadd.f32 %v369_v13, %v266_v24 }
  0xe0   : > { %v371_v15 = vpop.f32.mrf.mxu0 }
  0xe1   : > { %v372_v29 = vadd.f32 %v371_v15, %v266_v24  ;;  %v400_v40 = vmul.f32 0.70710677, %v370_v32  ;;  %v392_v5 = vmul.f32 0.5, %v370_v32 }
  0xe2   : > { %v375_v16 = vpop.f32.mrf.mxu0 }
  0xe3   : > { %v376_v27 = vadd.f32 %v375_v16, %v271_v17  ;;  %v401_v38 = vmul.f32 0.70710677, %v372_v29  ;;  %v393_v3 = vmul.f32 0.5, %v372_v29 }
  0xe4   : > { %v377_v18 = vpop.f32.mrf.mxu0 }
  0xe5   : > { %v378_v19 = vadd.f32 %v377_v18, %v271_v17  ;;  %v402_v37 = vmul.f32 0.70710677, %v376_v27  ;;  %v394_v0 = vmul.f32 0.5, %v376_v27 }
  0xe6   : > { %v381_v21 = vpop.f32.mrf.mxu0 }
  0xe7   : > { %v382_v22 = vadd.f32 %v381_v21, %v276_v20  ;;  %v403_v25 = vmul.f32 0.70710677, %v378_v19  ;;  %v395_v61 = vmul.f32 0.5, %v378_v19 }
  0xe8   : > { %v383_v23 = vpop.f32.mrf.mxu0 }
  0xe9   : > { %v384_v26 = vadd.f32 %v383_v23, %v276_v20  ;;  %v404_v33 = vmul.f32 0.70710677, %v382_v22  ;;  %694 = verf.f32 %v403_v25  ;;  %v396_v58 = vmul.f32 0.5, %v382_v22 }
  0xea   : > { %v387_v28 = vpop.f32.mrf.mxu0 }
  0xeb   : > { %v405_v30 = vmul.f32 0.70710677, %v384_v26  ;;  %v388_v31 = vadd.f32 %v387_v28, %v281_v14  ;;  %v397_v55 = vmul.f32 0.5, %v384_v26 }
  0xec   : > { %v389_v34 = vpop.f32.mrf.mxu0 }
  0xed   : > { %v406_v35 = vmul.f32 0.70710677, %v388_v31  ;;  %v390_v36 = vadd.f32 %v389_v34, %v281_v14  ;;  %696 = verf.f32 %v405_v30  ;;  %v398_v52 = vmul.f32 0.5, %v388_v31 }
  0xef   : > { %698 = verf.f32 %v406_v35  ;;  %v407_v39 = vmul.f32 0.70710677, %v390_v36  ;;  %v399_v48 = vmul.f32 0.5, %v390_v36 }
  0xf0   : > { %700 = verf.f32 %v404_v33 }
  0xf1   : > { %702 = verf.f32 %v407_v39 }
  0xf2   : > { %704 = verf.f32 %v402_v37 }
  0xf3   : > { %706 = verf.f32 %v401_v38 }
  0xf4   : > { %708 = verf.f32 %v400_v40 }
  0xf6   : > { %v695_v41 = vpop.eup %694 }
  0xf7   : > { %v419_v57 = vadd.f32 1.0, %v695_v41 }
  0xf9   : > { %v427_v4 = vmul.f32 %v419_v57, %v395_v61 }
  0xfa   : > { %v697_v42 = vpop.eup %696 }
  0xfb   : > { %v421_v50 = vadd.f32 1.0, %v697_v42 }
  0xfc   : > { %v699_v43 = vpop.eup %698 }
  0xfd   : > { %v701_v44 = vpop.eup %700  ;;  %v422_v46 = vadd.f32 1.0, %v699_v43  ;;  %v429_v62 = vmul.f32 %v421_v50, %v397_v55 }
  0xfe   : > { %v703_v45 = vpop.eup %702  ;;  %v420_v53 = vadd.f32 1.0, %v701_v44 }
  0xff   : > { %v705_v47 = vpop.eup %704  ;;  %v423_v49 = vadd.f32 1.0, %v703_v45  ;;  %v430_v59 = vmul.f32 %v422_v46, %v398_v52 }
 0x100   : > { %v707_v51 = vpop.eup %706  ;;  %v418_v60 = vadd.f32 1.0, %v705_v47  ;;  %v428_v1 = vmul.f32 %v420_v53, %v396_v58 }
 0x101   : > { %v709_v54 = vpop.eup %708  ;;  %v431_v56 = vmul.f32 %v423_v49, %v399_v48  ;;  %v417_v63 = vadd.f32 1.0, %v707_v51 }
 0x102   : > { %v416_v2 = vadd.f32 1.0, %v709_v54  ;;  %v426_v6 = vmul.f32 %v418_v60, %v394_v0 }
 0x103   : > { %467 = vmatprep.subr.mxu1 %v431_v56  ;;  %v425_v7 = vmul.f32 %v417_v63, %v393_v3 }
 0x104   : > { %468 = vmatpush1.msra.mxu1 %v430_v59  ;;  %v424_v8 = vmul.f32 %v416_v2, %v392_v5 }
 0x105   : > { %469 = vmatprep.subr.mxu1 %v429_v62 }
 0x106   : > { %470 = vmatpush1.msra.mxu1 %v428_v1 }
 0x107   : > { %471 = vmatprep.subr.mxu1 %v427_v4 }
 0x108   : > { %472 = vmatpush1.msra.mxu1 %v426_v6 }
 0x109   : > { %473 = vmatprep.subr.mxu1 %v425_v7 }
 0x10a   : > { %474 = vmatpush1.msra.mxu1 %v424_v8 }
 0x10b   : > { %626 = vmatmul.mubr.msk.f32.vlgmr.msra.gmra.mxu1 %vm439_vm2, %v432_v9 }
 0x1cb   : > { %v509_v10 = vpop.f32.mrf.mxu1 }
 0x1cc   : > { %v510_v13 = vadd.f32 %v509_v10, %v437_v11 }
 0x1cd   : > { %v511_v12 = vpop.f32.mrf.mxu1 }
 0x1ce   : > { %v512_v14 = vadd.f32 %v511_v12, %v437_v11 }
 0x1d0   : > { %v516_v15 = vcombine.low %v510_v13, %v512_v14 }
 0x1d2   : > { %518 = vst [vmem:[%s242_s27] sm:$0xff] %v516_v15 }
 0x1d3   : > { %723 = shalt.err (!%p720_p5)
}
 0x1d4   : > { %s724_s14 = scalar_lea.hbm %s534_s9, 128  ;;  %s728_s17 = scalar_lea.hbm %s955_s5, 256 }
 0x1d5   : > { %p725_p6 = scmp.ne.s32.totalorder %s534_s9, %s724_s14  ;;  %p729_p10 = scmp.lt.s32.totalorder %s534_s9, %s955_s5 }
 0x1d6   : > { %p730_p11 = scmp.lt.s32.totalorder %s728_s17, %s724_s14 }
 0x1d7   : > { %p726_p7 = pnand %p725_p6, %p861_p4 }
 0x1d8   : > { %p731_p12 = por %p730_p11, %p729_p10 }
 0x1d9   : > { %p727_p9 = pneg %p726_p7 }
 0x1db   : > { %p732_p13 = pnand %p731_p12, %p727_p9 }
 0x1dd   : > { %735 = shalt.err (!%p732_p13)
}
 0x1de   : > { %634 = dma.vmem_to_hbm [thread:$0]  (%p861_p4), %s537_s29, 128, %s534_s9, %s520_s10  }
 0x1df PF: > { %p640_p0 = scmp.ge.s32.totalorder %s786_s23, 2  ;;  %s548_s27 = sand.u32 1, %s766_s18  }
 0x1e0   : > { %s549_s7 = scalar_lea.sflag [#allocation3], %s548_s27 }
 0x1e1   : > { %p637_p1 = pnand %p640_p0, %p868_p8 }
 0x1e3   : > { %p638_p2 = pneg %p637_p1 }
 0x1e5   : > { %761 = dma.done.wait (%p638_p2), %s549_s7, 128  }
 0x1e6   : > { %763 = vsyncadd (%p638_p2), %s549_s7, 4294967168  ;;  %s18_s23 = sadd.s32 1, %s786_s23   ;;  %s958_s18 = smov %s770_s19 }
 0x1e7   : > { %p15_p3 = scmp.ge.s32.totalorder %s18_s23, 4   ;;  %s959_s19 = smov %s774_s20 }
 0x1e8   : > { %s960_s20 = smov %s874_s6  ;;  %s961_s21 = smov %s782_s22 }
 0x1e9   : > { %s962_s22 = smov %s964_s26  ;;  %17 = sbr.rel (!%p15_p3) target bundleno = 4 (0x4), region = 75 }
 0x1ee   :  { %554 = vsyncpa [#allocation3], 1 }
 0x1ef   :  { %556 = vsyncpa [#allocation3 + $0x1], 1 }

</bundles_post_ra>
